<compile_context>
chip_gen: v5e
topology: v5e:2x2
jax: 0.10.0
libtpu: 0.0.40
codegen_flags: <defaults>
</compile_context>

<pallas_src>
import jax
import jax.numpy as jnp
from jax.experimental import pallas as pl
from jax.experimental.pallas import tpu as pltpu


def _round_up(a, b):
    return (a + b - 1) // b * b


def _ffn_resident_kernel(x_ref, w1_ref, w2_ref, bias_ref, o_ref):
    # x_ref: (tm, Hp)   w1_ref/w2_ref: (Hp, Hp) resident   bias_ref: (1, Hp) f32
    x = x_ref[...]
    h = jnp.dot(x.astype(w1_ref.dtype), w1_ref[...],
                preferred_element_type=jnp.float32)
    y = jnp.dot(h.astype(w2_ref.dtype), w2_ref[...],
                preferred_element_type=jnp.float32)
    o_ref[...] = (y + bias_ref[...] + x.astype(jnp.float32)).astype(o_ref.dtype)


def _ffn_stream_kernel(x_ref, w1_ref, w2_ref, bias_ref, o_ref, acc_ref):
    # Fallback for weights too large for VMEM residency.
    # x_ref: (tm, Hp)   w1_ref: (Hp, tk)   w2_ref: (tk, Hp)   bias_ref: (1, Hp)
    k = pl.program_id(1)
    x = x_ref[...]
    h = jnp.dot(x.astype(w1_ref.dtype), w1_ref[...],
                preferred_element_type=jnp.float32)
    contrib = jnp.dot(h.astype(w2_ref.dtype), w2_ref[...],
                      preferred_element_type=jnp.float32)

    @pl.when(k == 0)
    def _first():                     # direct write: no zero-init + RMW on step 0
        acc_ref[...] = contrib

    @pl.when(k > 0)
    def _accumulate():
        acc_ref[...] += contrib

    @pl.when(k == pl.num_programs(1) - 1)
    def _finalize():
        o_ref[...] = (acc_ref[...] + bias_ref[...]
                      + x.astype(jnp.float32)).astype(o_ref.dtype)


def pointwise_feedforward(x, w1, b1, w2, b2, *, compute_dtype=None):
    """x: (B, L, H).  w1, w2: (H_out, H_in) Conv1d k=1 kernels (squeezed).  b1, b2: (H,).

    compute_dtype: dtype fed to the MXU (default: x.dtype). Pass jnp.bfloat16 for
    ~4-8x MXU throughput / half the weight bytes; accumulation stays f32.
    """
    B, L, H = x.shape
    M = B * L
    out_dtype = x.dtype
    compute_dtype = jnp.dtype(compute_dtype if compute_dtype is not None else x.dtype)
    bx = jnp.dtype(x.dtype).itemsize
    bc = compute_dtype.itemsize

    # Lane dim: pad to a multiple of 128 only for H >= 128.  For small H, padding would
    # inflate FLOPs/weight bytes by (Hp/H)^2 and full-dim blocks are legal anyway.
    Hp = _round_up(H, 128) if H >= 128 else H
    dH = Hp - H

    # Pre-transpose weights, cast to compute dtype, zero-pad.  Fold b1 into a single
    # output-side bias: bias_out = b1 @ W2^T + b2 (f32).  Padded channels stay exactly
    # zero through both matmuls, so the final slice is exact.
    # TODO(synk): cache the transposed/padded/cast weights + folded bias at model init.
    w1t = w1.T.astype(compute_dtype)
    w2t = w2.T.astype(compute_dtype)
    bias = (b1.astype(jnp.float32) @ w2.T.astype(jnp.float32)
            + b2.astype(jnp.float32)).reshape(1, H)
    if dH:
        w1t = jnp.pad(w1t, ((0, dH), (0, dH)))
        w2t = jnp.pad(w2t, ((0, dH), (0, dH)))
        bias = jnp.pad(bias, ((0, 0), (0, dH)))

    xm = x.reshape(M, H)
    if dH:
        xm = jnp.pad(xm, ((0, 0), (0, dH)))

    # Generation-aware VMEM budget: 128 MiB (v5e/v6e) vs 64 MiB (v7x).
    try:
        vmem_cap = int(pltpu.get_tpu_info().vmem_capacity_bytes)
    except Exception:
        vmem_cap = 64 * 1024 * 1024              # conservative (v7x-sized) fallback
    budget = int(vmem_cap * 0.65)                # headroom for layout padding / scratch
    limit_cap = int(vmem_cap * 0.90)

    # Row tile: big for pipeline efficiency, but cap so the 'parallel' row axis has at
    # least 2 blocks when there is enough work (v7x megacore). On 1-TC chips the extra
    # grid step is ~0.35 us and the resident weights are not re-fetched, so it is free.
    Mp8 = _round_up(M, 8)
    tm_cap = 1024
    if Mp8 >= 256:
        tm_cap = min(tm_cap, max(128, (Mp8 // 2) // 8 * 8))
    tm = min(tm_cap, Mp8)

    def resident_need(tm_):
        # 2x-buffered x & out tiles, 2x-buffered (but fetched-once) weights, f32 bias.
        return (2 * tm_ * Hp * bx + 4 * Hp * Hp * bc + 2 * tm_ * Hp * bx + 2 * Hp * 4)

    if resident_need(min(tm, 128)) <= budget:
        # ---------- Resident path (common case): weights live in VMEM, grid = rows ----------
        while resident_need(tm) > budget and tm > 128:
            tm = max(128, (tm // 2) // 8 * 8)
        Mp = _round_up(M, tm)
        if Mp != M:
            xm = jnp.pad(xm, ((0, Mp - M), (0, 0)))
        need = resident_need(tm)
        vmem_limit = min(max(int(need * 1.3), 32 * 1024 * 1024), limit_cap)

        cost = pl.CostEstimate(
            flops=4 * Mp * Hp * Hp,
            transcendentals=0,
            bytes_accessed=bx * 2 * Mp * Hp + bc * 2 * Hp * Hp + 4 * Hp,
        )
        out = pl.pallas_call(
            _ffn_resident_kernel,
            out_shape=jax.ShapeDtypeStruct((Mp, Hp), out_dtype),
            grid_spec=pltpu.PrefetchScalarGridSpec(
                num_scalar_prefetch=0,
                grid=(Mp // tm,),
                in_specs=[
                    pl.BlockSpec((tm, Hp), lambda i: (i, 0)),   # x rows
                    pl.BlockSpec((Hp, Hp), lambda i: (0, 0)),   # W1^T (resident)
                    pl.BlockSpec((Hp, Hp), lambda i: (0, 0)),   # W2^T (resident)
                    pl.BlockSpec((1, Hp), lambda i: (0, 0)),    # folded bias
                ],
                out_specs=pl.BlockSpec((tm, Hp), lambda i: (i, 0)),
            ),
            compiler_params=pltpu.CompilerParams(
                dimension_semantics=("parallel",),
                vmem_limit_bytes=vmem_limit,
            ),
            cost_estimate=cost,
        )(xm, w1t, w2t, bias)
    else:
        # ---------- Streaming path (huge H): chunk the intermediate dim, f32 accumulator ----------
        nbuf = 3  # deeper buffering to hide weight DMA under the MXU
        cand_tk = [c for c in (1024, 512, 256, 128) if Hp % c == 0]
        tk = cand_tk[0]

        def stream_need(tm_, tk_):
            return (2 * tm_ * Hp * bx            # x tiles
                    + 2 * nbuf * Hp * tk_ * bc   # W1^T / W2^T chunks
                    + 2 * tm_ * Hp * bx          # out tiles
                    + tm_ * Hp * 4               # f32 accumulator scratch
                    + 2 * Hp * 4)                # bias

        ci = 0
        while stream_need(tm, tk) > budget and ci + 1 < len(cand_tk):
            ci += 1
            tk = cand_tk[ci]
        while stream_need(tm, tk) > budget and tm > 128:
            tm = max(128, (tm // 2) // 8 * 8)

        Mp = _round_up(M, tm)
        if Mp != M:
            xm = jnp.pad(xm, ((0, Mp - M), (0, 0)))
        need = stream_need(tm, tk)
        vmem_limit = min(max(int(need * 1.3), 32 * 1024 * 1024), limit_cap)

        cost = pl.CostEstimate(
            flops=4 * Mp * Hp * Hp,
            transcendentals=0,
            # Weights are re-fetched once per row block in this path.
            bytes_accessed=(bx * 2 * Mp * Hp
                            + (Mp // tm) * bc * 2 * Hp * Hp + 4 * Hp),
        )
        out = pl.pallas_call(
            _ffn_stream_kernel,
            out_shape=jax.ShapeDtypeStruct((Mp, Hp), out_dtype),
            grid_spec=pltpu.PrefetchScalarGridSpec(
                num_scalar_prefetch=0,
                grid=(Mp // tm, Hp // tk),       # rows (parallel), K (arbitrary, last)
                in_specs=[
                    pl.BlockSpec((tm, Hp), lambda i, k: (i, 0)),
                    pl.BlockSpec((Hp, tk), lambda i, k: (0, k),
                                 pipeline_mode=pl.Buffered(nbuf)),
                    pl.BlockSpec((tk, Hp), lambda i, k: (k, 0),
                                 pipeline_mode=pl.Buffered(nbuf)),
                    pl.BlockSpec((1, Hp), lambda i, k: (0, 0)),
                ],
                out_specs=pl.BlockSpec((tm, Hp), lambda i, k: (i, 0)),
                scratch_shapes=[pltpu.VMEM((tm, Hp), jnp.float32)],
            ),
            compiler_params=pltpu.CompilerParams(
                dimension_semantics=("parallel", "arbitrary"),
                vmem_limit_bytes=vmem_limit,
            ),
            cost_estimate=cost,
        )(xm, w1t, w2t, bias)

    return out[:M, :H].reshape(B, L, H)


def _init_params(key, hidden):
    # Deterministic init mimicking PyTorch Conv1d default (uniform in +/- 1/sqrt(fan_in)).
    k1, k2, k3, k4 = jax.random.split(key, 4)
    bound = 1.0 / jnp.sqrt(hidden)
    w1 = jax.random.uniform(k1, (hidden, hidden), jnp.float32, -bound, bound)
    b1 = jax.random.uniform(k2, (hidden,), jnp.float32, -bound, bound)
    w2 = jax.random.uniform(k3, (hidden, hidden), jnp.float32, -bound, bound)
    b2 = jax.random.uniform(k4, (hidden,), jnp.float32, -bound, bound)
    return w1, b1, w2, b2


if __name__ == "__main__":
    B, L, H = 2, 8, 32
    key = jax.random.PRNGKey(0)
    kx, kp = jax.random.split(key)
    x = jax.random.normal(kx, (B, L, H), jnp.float32)
    w1, b1, w2, b2 = _init_params(kp, H)

    out = jax.block_until_ready(pointwise_feedforward(x, w1, b1, w2, b2))

    # Pure-JAX reference (pointwise conv == matmul over hidden; no activation here).
    ref = (x @ w1.T + b1) @ w2.T + b2 + x
    assert out.shape == (B, L, H)
    assert jnp.allclose(out, ref, atol=1e-4, rtol=1e-4), float(jnp.abs(out - ref).max())

    print("KERNEL_OK")
</pallas_src>

<mosaic_0001>
module attributes {stable_mosaic.version = 11 : i64} {
  func.func @_ffn_resident_kernel(%arg0: i32, %arg1: memref<16x32xf32, #tpu.memory_space<vmem>>, %arg2: memref<32x32xf32, #tpu.memory_space<vmem>>, %arg3: memref<32x32xf32, #tpu.memory_space<vmem>>, %arg4: memref<1x32xf32, #tpu.memory_space<vmem>>, %arg5: memref<16x32xf32, #tpu.memory_space<vmem>>) attributes {dimension_semantics = [#tpu.dimension_semantics<parallel>], iteration_bounds = array<i64: 1>, scalar_prefetch = 0 : i64, scratch_operands = 0 : i64, tpu.core_type = #tpu.core_type<tc>, window_params = [{transform_indices = @transform_0, window_bounds = array<i64: 16, 32>}, {pipeline_mode = #tpu.pipeline_mode<synchronous>, transform_indices = @transform_1, window_bounds = array<i64: 32, 32>}, {pipeline_mode = #tpu.pipeline_mode<synchronous>, transform_indices = @transform_2, window_bounds = array<i64: 32, 32>}, {pipeline_mode = #tpu.pipeline_mode<synchronous>, transform_indices = @transform_3, window_bounds = array<i64: 1, 32>}, {transform_indices = @transform_4, window_bounds = array<i64: 16, 32>}]} {
    %c0 = arith.constant 0 : index
    %c0_0 = arith.constant 0 : index
    %0 = vector.load %arg1[%c0, %c0_0] : memref<16x32xf32, #tpu.memory_space<vmem>>, vector<16x32xf32>
    %c0_1 = arith.constant 0 : index
    %c0_2 = arith.constant 0 : index
    %1 = vector.load %arg2[%c0_1, %c0_2] : memref<32x32xf32, #tpu.memory_space<vmem>>, vector<32x32xf32>
    %cst = arith.constant dense<0.000000e+00> : vector<16x32xf32>
    %2 = tpu.matmul %0, %1, %cst {dimension_numbers = #tpu.dot_dimension_numbers<[1], [0], [0], [1], [0, 0, 1, 1], [], []>} : vector<16x32xf32>, vector<32x32xf32>, vector<16x32xf32> -> vector<16x32xf32>
    %c0_3 = arith.constant 0 : index
    %c0_4 = arith.constant 0 : index
    %3 = vector.load %arg3[%c0_3, %c0_4] : memref<32x32xf32, #tpu.memory_space<vmem>>, vector<32x32xf32>
    %cst_5 = arith.constant dense<0.000000e+00> : vector<16x32xf32>
    %4 = tpu.matmul %2, %3, %cst_5 {dimension_numbers = #tpu.dot_dimension_numbers<[1], [0], [0], [1], [0, 0, 1, 1], [], []>} : vector<16x32xf32>, vector<32x32xf32>, vector<16x32xf32> -> vector<16x32xf32>
    %c0_6 = arith.constant 0 : index
    %c0_7 = arith.constant 0 : index
    %5 = vector.load %arg4[%c0_6, %c0_7] : memref<1x32xf32, #tpu.memory_space<vmem>>, vector<1x32xf32>
    %6 = vector.broadcast %5 : vector<1x32xf32> to vector<16x32xf32>
    %7 = arith.addf %4, %6 : vector<16x32xf32>
    %8 = arith.addf %7, %0 : vector<16x32xf32>
    %c0_8 = arith.constant 0 : index
    %c0_9 = arith.constant 0 : index
    %9 = vector.load %arg5[%c0_8, %c0_9] : memref<16x32xf32, #tpu.memory_space<vmem>>, vector<16x32xf32>
    tpu.vector_store %arg5[%c0_8, %c0_9], %8 {strides = array<i32>} : memref<16x32xf32, #tpu.memory_space<vmem>>, vector<16x32xf32>,
    return
  }
  func.func @transform_0(%arg0: i32) -> (i32, i32) {
    %c0_i32 = arith.constant 0 : i32
    %c0_i32_0 = arith.constant 0 : i32
    return %arg0, %c0_i32 : i32, i32
  }
  func.func @transform_1(%arg0: i32) -> (i32, i32) {
    %c0_i32 = arith.constant 0 : i32
    %c0_i32_0 = arith.constant 0 : i32
    %c0_i32_1 = arith.constant 0 : i32
    return %c0_i32, %c0_i32_0 : i32, i32
  }
  func.func @transform_2(%arg0: i32) -> (i32, i32) {
    %c0_i32 = arith.constant 0 : i32
    %c0_i32_0 = arith.constant 0 : i32
    %c0_i32_1 = arith.constant 0 : i32
    return %c0_i32, %c0_i32_0 : i32, i32
  }
  func.func @transform_3(%arg0: i32) -> (i32, i32) {
    %c0_i32 = arith.constant 0 : i32
    %c0_i32_0 = arith.constant 0 : i32
    %c0_i32_1 = arith.constant 0 : i32
    return %c0_i32, %c0_i32_0 : i32, i32
  }
  func.func @transform_4(%arg0: i32) -> (i32, i32) {
    %c0_i32 = arith.constant 0 : i32
    %c0_i32_0 = arith.constant 0 : i32
    return %arg0, %c0_i32 : i32, i32
  }
}

</mosaic_0001>

<bundles_post_ra>
// kernel: tpu_custom_call.1
= control target key start
LH: loop header
LB: loop body
LE: loop exit
PB: predicated region body
PF: predicated region fallthrough
CT: control target
= control target key end

     0   :  { %9 = vsyncpa [#allocation3], 0  ;;  %s347_s0 = inlined_call_operand.hbm [shape: f32[16,32], index: 0, kind: input, shape index: {}]   ;;  %s348_s1 = inlined_call_operand.hbm [shape: f32[32,32], index: 1, kind: input, shape index: {}]   ;;  %s349_s2 = inlined_call_operand.hbm [shape: f32[32,32], index: 2, kind: input, shape index: {}]   ;;  %s350_s3 = inlined_call_operand.vmem [shape: f32[1,32], index: 3, kind: input, shape index: {}]   ;;  %s351_s4 = inlined_call_operand.hbm [shape: f32[16,32], index: 4, kind: output, shape index: {}]  }
   0x1   :  { %10 = vsyncpa [#allocation6], 0 }
   0x2   :  { %11 = vsyncpa [#allocation4], 0  ;;  %s29_s17 = sshll.u32 %s348_s1, 4  ;;  %s283_s18 = smov [#allocation5]   ;;  %s30_s17 = int_to_ptr.hbm [resolvable:$true] %s29_s17 }
   0x3   :  { %s31_s19 = sshll.u32 %s283_s18, 4  ;;  %s16_s22 = sshll.u32 %s347_s0, 4  ;;  %s32_s19 = int_to_ptr.vmem [resolvable:$true] %s31_s19  ;;  %s17_s22 = int_to_ptr.hbm [resolvable:$true] %s16_s22 }
   0x4   :  { %s284_s23 = smov 128   ;;  %s285_s24 = smov 8  }
   0x5   :  { %37 = dma.hbm_to_vmem [thread:$0]  %s30_s17, 512, %s32_s19, [#allocation6], %s284_s23, %s284_s23, %s285_s24  }
   0x6   :  { %s286_s25 = smov [#allocation2]   ;;  %s42_s1 = sshll.u32 %s349_s2, 4  ;;  %s43_s1 = int_to_ptr.hbm [resolvable:$true] %s42_s1 }
   0x7   :  { %s18_s26 = sshll.u32 %s286_s25, 4  ;;  %s287_s0 = smov [#allocation7]   ;;  %s19_s26 = int_to_ptr.vmem [resolvable:$true] %s18_s26 }
   0x8   :  { %24 = dma.hbm_to_vmem [thread:$0]  %s17_s22, 256, %s19_s26, [#allocation3], %s284_s23, %s284_s23, %s285_s24  }
   0x9   :  { %s44_s29 = sshll.u32 %s287_s0, 4  ;;  %s45_s29 = int_to_ptr.vmem [resolvable:$true] %s44_s29 }
   0xa   :  { %50 = dma.hbm_to_vmem [thread:$0]  %s43_s1, 512, %s45_s29, [#allocation6], %s284_s23, %s284_s23, %s285_s24  }
   0xb   :  { %277 = dma.done.wait [#allocation3], 256  }
   0xc   :  { %278 = vsyncadd [#allocation3], 4294967040 }
   0xd   :  { %279 = dma.done.wait [#allocation6], 1024  }
   0xe   :  { %280 = vsyncadd [#allocation6], 4294966272  ;;  %v70_v0 = vld [vmem:[#allocation5 + $0x18] sm:$0xff]  ;;  %v69_v1 = vld [vmem:[#allocation5 + $0x10] sm:$0xff]  ;;  %vm71_vm0 = vcmask 261120   ;;  %s288_s5 = smov [#allocation8]  }
   0xf   :  { %166 = vmatpush.msra.mxu2 %v70_v0  ;;  %90 = vmatpush.msra.mxu0 %v70_v0  ;;  %v68_v2 = vld [vmem:[#allocation5 + $0x8] sm:$0xff]  ;;  %v104_v3 = vld [vmem:[#allocation7 + $0x18] sm:$0xff]  ;;  %v103_v4 = vld [vmem:[#allocation7 + $0x10] sm:$0xff]  ;;  %s146_s6 = sshll.u32 %s288_s5, 4  ;;  %s148_s9 = sshll.u32 %s351_s4, 4  ;;  %s147_s6 = int_to_ptr.vmem [resolvable:$true] %s146_s6  ;;  %s149_s9 = int_to_ptr.hbm [resolvable:$true] %s148_s9 }
  0x10   :  { %v67_v5 = vld [vmem:[#allocation5] sm:$0xff]  ;;  %170 = vmatpush.msra.mxu3 %v104_v3  ;;  %127 = vmatpush.msra.mxu1 %v104_v3  ;;  %v66_v6 = vld [vmem:[#allocation2 + $0x8] sm:$0xff]  ;;  %v65_v7 = vld [vmem:[#allocation2] sm:$0xff] }
  0x11   :  { %167 = vmatpush.msra.mxu2 %v69_v1  ;;  %91 = vmatpush.msra.mxu0 %v69_v1  ;;  %v102_v8 = vld [vmem:[#allocation7 + $0x8] sm:$0xff]  ;;  %v101_v9 = vld [vmem:[#allocation7] sm:$0xff]  ;;  %v180_v12 = vld [vmem:[%s350_s3] ss:$0 sm:$0xff] }
  0x12   :  { %171 = vmatpush.msra.mxu3 %v103_v4  ;;  %128 = vmatpush.msra.mxu1 %v103_v4 }
  0x13   :  { %168 = vmatpush.msra.mxu2 %v68_v2  ;;  %92 = vmatpush.msra.mxu0 %v68_v2 }
  0x14   :  { %172 = vmatpush.msra.mxu3 %v102_v8  ;;  %129 = vmatpush.msra.mxu1 %v102_v8 }
  0x15   :  { %169 = vmatpush.msra.mxu2 %v67_v5  ;;  %93 = vmatpush.msra.mxu0 %v67_v5 }
  0x16   :  { %163 = vmatmul.msk.f32.vlgmr.msra.gmra.mxu2 %vm71_vm0, %v66_v6  ;;  %162 = vmatmul.msk.f32.vlgmr.msra.gmra.mxu0 %vm71_vm0, %v65_v7 }
  0x17   :  { %173 = vmatpush.msra.mxu3 %v101_v9  ;;  %130 = vmatpush.msra.mxu1 %v101_v9 }
  0x93   :  { %v95_v10 = vpop.f32.mrf.mxu0 }
  0x94   :  { %164 = vmatmul.msk.f32.vlgmr.msra.gmra.mxu1 %vm71_vm0, %v95_v10 }
  0x99   :  { %v98_v11 = vpop.f32.mrf.mxu2 }
  0x9a   :  { %165 = vmatmul.msk.f32.vlgmr.msra.gmra.mxu3 %vm71_vm0, %v98_v11 }
 0x111   :  { %v132_v13 = vpop.f32.mrf.mxu1 }
 0x112   :  { %v133_v14 = vadd.f32 %v180_v12, %v132_v13 }
 0x114   :  { %v138_v15 = vadd.f32 %v133_v14, %v65_v7 }
 0x116   :  { %140 = vst.msk [vmem:[#allocation8] sm:$0xff] %vm71_vm0, %v138_v15 }
 0x11d   :  { %v135_v16 = vpop.f32.mrf.mxu3 }
 0x11e   :  { %v136_v17 = vadd.f32 %v180_v12, %v135_v16 }
 0x120   :  { %v139_v18 = vadd.f32 %v136_v17, %v66_v6 }
 0x122   :  { %141 = vst.msk [vmem:[#allocation8 + $0x8] sm:$0xff] %vm71_vm0, %v139_v18 }
 0x123   :  { %154 = dma.vmem_to_hbm [thread:$0]  %s147_s6, 256, %s149_s9, [#allocation4], %s284_s23, %s284_s23, %s285_s24  }
 0x124   :  { %281 = dma.done.wait [#allocation4], 256  }
 0x125   :  { %282 = vsyncadd [#allocation4], 4294967040 }
 0x126   :  { %159 = vsyncpa [#allocation3], 1 }
 0x127   :  { %160 = vsyncpa [#allocation6], 1 }
 0x128   :  { %161 = vsyncpa [#allocation4], 1 }

</bundles_post_ra>
